<compile_context>
chip_gen: v6e
topology: v6e:2x2x1
jax: 0.10.0
libtpu: 0.0.40
codegen_flags: <defaults>
</compile_context>

<pallas_src>
import functools

import jax
import jax.numpy as jnp
from jax.experimental import pallas as pl
from jax.experimental.pallas import tpu as pltpu


def _round_up(x, m):
    return ((x + m - 1) // m) * m


def _cdiv(a, b):
    return -(-a // b)


def _attention_kernel(am_ref, lm_ref, w1t_ref, w2t_ref, w3_ref, out_ref, *, valid_seq):
    # am_ref : (TB, S, E) f32   all_memory block (TB batch rows of the sequence)
    # lm_ref : (TB, E)    f32   last_memory rows for this block
    # w1t_ref: (E, E)     f32   W1^T  (in, out) -- pre-transposed in the wrapper
    # w2t_ref: (E, E)     f32   W2^T  (in, out)
    # w3_ref : (1, E)     f32   W3 row
    # out_ref: (TB, E)
    TB, S, E = am_ref.shape

    am = am_ref[...]                                    # (TB, S, E) f32 value path
    am2d = am.reshape(TB * S, E)                        # free sublane-dim merge (S % 8 == 0)

    # Shared-weight projections on the MXU (f32 operands; MXU passes are hidden
    # under the all_memory DMA since the kernel is memory-bound).
    a1 = jnp.dot(am2d, w1t_ref[...], preferred_element_type=jnp.float32)   # (TB*S, E)
    a2 = jnp.dot(lm_ref[...], w2t_ref[...], preferred_element_type=jnp.float32)  # (TB, E)

    # f32 elementwise path (sigmoid on EUP/VPU; works on every generation).
    h = jax.nn.sigmoid(a1.reshape(TB, S, E) + a2[:, None, :])              # (TB, S, E)

    # scores as (TB, S): sequence on the lane axis (lane-dense softmax).
    # W3 bias omitted: softmax(x + c) == softmax(x).
    scores = jnp.sum(h * w3_ref[...][None], axis=-1)                       # (TB, S)

    if valid_seq < S:
        # Padded sequence positions must receive zero softmax mass.
        seq_idx = jax.lax.broadcasted_iota(jnp.int32, (TB, S), 1)
        scores = jnp.where(seq_idx < valid_seq, scores, -1e9)

    # Numerically-stable softmax over the sequence (last) axis, exact f32.
    m = jnp.max(scores, axis=-1, keepdims=True)
    e = jnp.exp(scores - m)
    w = e / jnp.sum(e, axis=-1, keepdims=True)                             # (TB, S)

    # attn[b] = sum_s w[b, s] * all_memory[b, s, :]
    # VPU multiply + XLU sublane reduce (S is the sublane axis); avoids TB tiny
    # M=1 f32 matmuls through the MXU.
    attn = jnp.sum(w[:, :, None] * am, axis=1)                             # (TB, E)
    out_ref[...] = attn.astype(out_ref.dtype)


def _tiling(batch, seq_pad, emb, target_block_bytes=2 << 20):
    """Bytes-based batch tiling.

    Returns (TB, B_pad) with:
      * TB a multiple of 8 (BlockSpec sublane rule for the (TB, E) blocks),
      * the all_memory block TB*seq_pad*emb*4 ~ target_block_bytes (amortize the
        ~0.35us per-step overhead; keep DMA per step in the microseconds),
      * B_pad a multiple of TB with B_pad // TB >= 2 grid steps (v7x dual TC).
    """
    row_bytes = seq_pad * emb * 4
    b8 = _round_up(batch, 8)
    total_bytes = b8 * row_bytes
    n_steps = max(2, _cdiv(total_bytes, target_block_bytes))
    tb = _round_up(_cdiv(b8, n_steps), 8)
    b_pad = max(_round_up(b8, tb), 2 * tb)
    return tb, b_pad


def narm_attention(all_memory, last_memory, w1, w2, w3, b3):
    """all_memory: (B, S, E) f32; last_memory: (1, B, E) f32.
    w1, w2: (E, E) PyTorch Linear weights (out x in); w3: (1, E); b3: (1,).
    b3 is accepted for API parity but unused (softmax is shift-invariant)."""
    B, S, E = all_memory.shape
    del b3  # softmax(x + c) == softmax(x): the W3 bias cannot change the output.

    out_dtype = all_memory.dtype
    am = jnp.asarray(all_memory, jnp.float32)
    lm = jnp.asarray(last_memory, jnp.float32).reshape(B, E)   # transpose(0,1) + squeeze

    # One-time weight prep: transpose to (in, out) so the kernel never transposes.
    w1_t = jnp.asarray(w1, jnp.float32).T
    w2_t = jnp.asarray(w2, jnp.float32).T
    w3_row = jnp.asarray(w3, jnp.float32).reshape(1, E)

    # Pad the sequence to a multiple of 8 so the (TB,S,E)->(TB*S,E) merge is a
    # free sublane-dim merge; padded positions are masked inside the kernel.
    S_pad = _round_up(S, 8)
    if S_pad != S:
        am = jnp.pad(am, ((0, 0), (0, S_pad - S), (0, 0)))

    TB, B_pad = _tiling(B, S_pad, E)
    if B_pad != B:
        am = jnp.pad(am, ((0, B_pad - B), (0, 0), (0, 0)))
        lm = jnp.pad(lm, ((0, B_pad - B), (0, 0)))

    grid = (B_pad // TB,)

    out = pl.pallas_call(
        functools.partial(_attention_kernel, valid_seq=S),
        out_shape=jax.ShapeDtypeStruct((B_pad, E), out_dtype),
        grid_spec=pltpu.PrefetchScalarGridSpec(
            num_scalar_prefetch=0,
            grid=grid,
            in_specs=[
                pl.BlockSpec((TB, S_pad, E), lambda b: (b, 0, 0)),   # all_memory block
                pl.BlockSpec((TB, E), lambda b: (b, 0)),             # last_memory rows
                pl.BlockSpec((E, E), lambda b: (0, 0)),              # W1^T
                pl.BlockSpec((E, E), lambda b: (0, 0)),              # W2^T
                pl.BlockSpec((1, E), lambda b: (0, 0)),              # W3 row
            ],
            out_specs=pl.BlockSpec((TB, E), lambda b: (b, 0)),
        ),
        compiler_params=pltpu.CompilerParams(
            dimension_semantics=("parallel",),
            vmem_limit_bytes=48 * 1024 * 1024),
    )(am, lm, w1_t, w2_t, w3_row)

    return out[:B]


def narm_attention_ref(all_memory, last_memory, w1, w2, w3, b3):
    """Pure-JAX f32 reference mirroring the PyTorch forward (mask=None)."""
    lm = jnp.transpose(last_memory, (1, 0, 2))                  # (B, 1, E)
    a1 = jnp.einsum('bse,oe->bso', all_memory, w1)              # W1(all_memory)
    a2 = jnp.einsum('bse,oe->bso', lm, w2)                      # W2(last_memory)
    h = jax.nn.sigmoid(a1 + a2)                                 # (B, S, E)
    scores = jnp.einsum('bse,oe->bso', h, w3)[..., 0] + b3[0]   # (B, S)
    w = jax.nn.softmax(scores, axis=1)                          # (B, S)
    return jnp.sum(w[..., None] * all_memory, axis=1)           # (B, E)


if __name__ == "__main__":
    E = 32
    key = jax.random.PRNGKey(0)
    (k_am, k_lm, k_w1, k_w2, k_w3, k_b3, k_am2, k_lm2) = jax.random.split(key, 8)

    # Deterministic "Linear" parameters (PyTorch layout: out_features x in_features)
    bound = 1.0 / (E ** 0.5)
    w1 = jax.random.uniform(k_w1, (E, E), jnp.float32, -bound, bound)
    w2 = jax.random.uniform(k_w2, (E, E), jnp.float32, -bound, bound)
    w3 = jax.random.uniform(k_w3, (1, E), jnp.float32, -bound, bound)
    b3 = jax.random.uniform(k_b3, (1,), jnp.float32, -bound, bound)

    # Case 1: the module's nominal small shapes.
    B, S = 2, 8
    all_memory = jax.random.normal(k_am, (B, S, E), dtype=jnp.float32)
    last_memory = jax.random.normal(k_lm, (1, B, E), dtype=jnp.float32)
    out = narm_attention(all_memory, last_memory, w1, w2, w3, b3)
    jax.block_until_ready(out)
    ref = narm_attention_ref(all_memory, last_memory, w1, w2, w3, b3)
    assert out.shape == (B, E)
    assert jnp.allclose(out, ref, atol=2e-2, rtol=2e-2), (out, ref)

    # Case 2: ragged shapes exercising batch/sequence padding + the pad mask.
    B2, S2 = 5, 7
    all_memory2 = jax.random.normal(k_am2, (B2, S2, E), dtype=jnp.float32)
    last_memory2 = jax.random.normal(k_lm2, (1, B2, E), dtype=jnp.float32)
    out2 = narm_attention(all_memory2, last_memory2, w1, w2, w3, b3)
    jax.block_until_ready(out2)
    ref2 = narm_attention_ref(all_memory2, last_memory2, w1, w2, w3, b3)
    assert out2.shape == (B2, E)
    assert jnp.allclose(out2, ref2, atol=2e-2, rtol=2e-2), (out2, ref2)

    print("KERNEL_OK")
</pallas_src>

<mosaic_0001>
module attributes {stable_mosaic.version = 11 : i64} {
  func.func @_attention_kernel(%arg0: i32, %arg1: memref<8x8x32xf32, #tpu.memory_space<vmem>>, %arg2: memref<8x32xf32, #tpu.memory_space<vmem>>, %arg3: memref<32x32xf32, #tpu.memory_space<vmem>>, %arg4: memref<32x32xf32, #tpu.memory_space<vmem>>, %arg5: memref<1x32xf32, #tpu.memory_space<vmem>>, %arg6: memref<8x32xf32, #tpu.memory_space<vmem>>) attributes {dimension_semantics = [#tpu.dimension_semantics<parallel>], iteration_bounds = array<i64: 2>, scalar_prefetch = 0 : i64, scratch_operands = 0 : i64, tpu.core_type = #tpu.core_type<tc>, window_params = [{transform_indices = @transform_0, window_bounds = array<i64: 8, 8, 32>}, {transform_indices = @transform_1, window_bounds = array<i64: 8, 32>}, {pipeline_mode = #tpu.pipeline_mode<synchronous>, transform_indices = @transform_2, window_bounds = array<i64: 32, 32>}, {pipeline_mode = #tpu.pipeline_mode<synchronous>, transform_indices = @transform_3, window_bounds = array<i64: 32, 32>}, {pipeline_mode = #tpu.pipeline_mode<synchronous>, transform_indices = @transform_4, window_bounds = array<i64: 1, 32>}, {transform_indices = @transform_5, window_bounds = array<i64: 8, 32>}]} {
    %c0 = arith.constant 0 : index
    %c0_0 = arith.constant 0 : index
    %c0_1 = arith.constant 0 : index
    %0 = vector.load %arg1[%c0, %c0_0, %c0_1] : memref<8x8x32xf32, #tpu.memory_space<vmem>>, vector<8x8x32xf32>
    %1 = vector.shape_cast %0 : vector<8x8x32xf32> to vector<64x32xf32>
    %c0_2 = arith.constant 0 : index
    %c0_3 = arith.constant 0 : index
    %2 = vector.load %arg3[%c0_2, %c0_3] : memref<32x32xf32, #tpu.memory_space<vmem>>, vector<32x32xf32>
    %cst = arith.constant dense<0.000000e+00> : vector<64x32xf32>
    %3 = tpu.matmul %1, %2, %cst {dimension_numbers = #tpu.dot_dimension_numbers<[1], [0], [0], [1], [0, 0, 1, 1], [], []>} : vector<64x32xf32>, vector<32x32xf32>, vector<64x32xf32> -> vector<64x32xf32>
    %c0_4 = arith.constant 0 : index
    %c0_5 = arith.constant 0 : index
    %4 = vector.load %arg2[%c0_4, %c0_5] : memref<8x32xf32, #tpu.memory_space<vmem>>, vector<8x32xf32>
    %c0_6 = arith.constant 0 : index
    %c0_7 = arith.constant 0 : index
    %5 = vector.load %arg4[%c0_6, %c0_7] : memref<32x32xf32, #tpu.memory_space<vmem>>, vector<32x32xf32>
    %cst_8 = arith.constant dense<0.000000e+00> : vector<8x32xf32>
    %6 = tpu.matmul %4, %5, %cst_8 {dimension_numbers = #tpu.dot_dimension_numbers<[1], [0], [0], [1], [0, 0, 1, 1], [], []>} : vector<8x32xf32>, vector<32x32xf32>, vector<8x32xf32> -> vector<8x32xf32>
    %7 = vector.shape_cast %3 : vector<64x32xf32> to vector<8x8x32xf32>
    %8 = vector.shape_cast %6 : vector<8x32xf32> to vector<8x1x32xf32>
    %9 = vector.broadcast %8 : vector<8x1x32xf32> to vector<8x8x32xf32>
    %10 = arith.addf %7, %9 : vector<8x8x32xf32>
    %11 = arith.negf %10 : vector<8x8x32xf32>
    %12 = math.exp %11 : vector<8x8x32xf32>
    %cst_9 = arith.constant 1.000000e+00 : f32
    %13 = vector.broadcast %cst_9 : f32 to vector<8x8x32xf32>
    %14 = arith.addf %13, %12 : vector<8x8x32xf32>
    %15 = arith.divf %13, %14 : vector<8x8x32xf32>
    %c0_10 = arith.constant 0 : index
    %c0_11 = arith.constant 0 : index
    %16 = vector.load %arg5[%c0_10, %c0_11] : memref<1x32xf32, #tpu.memory_space<vmem>>, vector<1x32xf32>
    %17 = vector.shape_cast %16 : vector<1x32xf32> to vector<1x1x32xf32>
    %18 = vector.broadcast %17 : vector<1x1x32xf32> to vector<8x8x32xf32>
    %19 = arith.mulf %15, %18 : vector<8x8x32xf32>
    %cst_12 = arith.constant dense<0.000000e+00> : vector<8x8xf32>
    %20 = vector.multi_reduction <add>, %19, %cst_12 [2] : vector<8x8x32xf32> to vector<8x8xf32>
    %cst_13 = arith.constant dense<0xFF800000> : vector<8xf32>
    %21 = vector.multi_reduction <maximumf>, %20, %cst_13 [1] : vector<8x8xf32> to vector<8xf32>
    %22 = vector.shape_cast %21 : vector<8xf32> to vector<8x1xf32>
    %23 = vector.broadcast %22 : vector<8x1xf32> to vector<8x8xf32>
    %24 = arith.subf %20, %23 : vector<8x8xf32>
    %25 = math.exp %24 : vector<8x8xf32>
    %cst_14 = arith.constant dense<0.000000e+00> : vector<8xf32>
    %26 = vector.multi_reduction <add>, %25, %cst_14 [1] : vector<8x8xf32> to vector<8xf32>
    %27 = vector.shape_cast %26 : vector<8xf32> to vector<8x1xf32>
    %28 = vector.broadcast %27 : vector<8x1xf32> to vector<8x8xf32>
    %29 = arith.divf %25, %28 : vector<8x8xf32>
    %30 = vector.shape_cast %29 : vector<8x8xf32> to vector<8x8x1xf32>
    %31 = vector.broadcast %30 : vector<8x8x1xf32> to vector<8x8x32xf32>
    %32 = arith.mulf %31, %0 : vector<8x8x32xf32>
    %cst_15 = arith.constant dense<0.000000e+00> : vector<8x32xf32>
    %33 = vector.multi_reduction <add>, %32, %cst_15 [1] : vector<8x8x32xf32> to vector<8x32xf32>
    %c0_16 = arith.constant 0 : index
    %c0_17 = arith.constant 0 : index
    %34 = vector.load %arg6[%c0_16, %c0_17] : memref<8x32xf32, #tpu.memory_space<vmem>>, vector<8x32xf32>
    tpu.vector_store %arg6[%c0_16, %c0_17], %33 {strides = array<i32>} : memref<8x32xf32, #tpu.memory_space<vmem>>, vector<8x32xf32>,
    return
  }
  func.func @transform_0(%arg0: i32) -> (i32, i32, i32) {
    %c0_i32 = arith.constant 0 : i32
    %c0_i32_0 = arith.constant 0 : i32
    %c0_i32_1 = arith.constant 0 : i32
    return %arg0, %c0_i32, %c0_i32_0 : i32, i32, i32
  }
  func.func @transform_1(%arg0: i32) -> (i32, i32) {
    %c0_i32 = arith.constant 0 : i32
    %c0_i32_0 = arith.constant 0 : i32
    return %arg0, %c0_i32 : i32, i32
  }
  func.func @transform_2(%arg0: i32) -> (i32, i32) {
    %c0_i32 = arith.constant 0 : i32
    %c0_i32_0 = arith.constant 0 : i32
    %c0_i32_1 = arith.constant 0 : i32
    return %c0_i32, %c0_i32_0 : i32, i32
  }
  func.func @transform_3(%arg0: i32) -> (i32, i32) {
    %c0_i32 = arith.constant 0 : i32
    %c0_i32_0 = arith.constant 0 : i32
    %c0_i32_1 = arith.constant 0 : i32
    return %c0_i32, %c0_i32_0 : i32, i32
  }
  func.func @transform_4(%arg0: i32) -> (i32, i32) {
    %c0_i32 = arith.constant 0 : i32
    %c0_i32_0 = arith.constant 0 : i32
    %c0_i32_1 = arith.constant 0 : i32
    return %c0_i32, %c0_i32_0 : i32, i32
  }
  func.func @transform_5(%arg0: i32) -> (i32, i32) {
    %c0_i32 = arith.constant 0 : i32
    %c0_i32_0 = arith.constant 0 : i32
    return %arg0, %c0_i32 : i32, i32
  }
}

</mosaic_0001>

<bundles_post_ra>
// kernel: tpu_custom_call.1
= control target key start
LH: loop header
LB: loop body
LE: loop exit
PB: predicated region body
PF: predicated region fallthrough
CT: control target
= control target key end

     0   :  { %s2117_s0 = inlined_call_operand.hbm [shape: f32[16,8,32], index: 0, kind: input, shape index: {}]   ;;  %s2118_s1 = inlined_call_operand.hbm [shape: f32[16,32], index: 1, kind: input, shape index: {}]   ;;  %s2119_s2 = inlined_call_operand.hbm [shape: f32[32,32], index: 2, kind: input, shape index: {}]   ;;  %s2120_s3 = inlined_call_operand.hbm [shape: f32[32,32], index: 3, kind: input, shape index: {}]   ;;  %s2121_s4 = inlined_call_operand.vmem [shape: f32[1,32], index: 4, kind: input, shape index: {}]   ;;  %s2122_s5 = inlined_call_operand.hbm [shape: f32[16,32], index: 5, kind: output, shape index: {}]  }
   0x1   :  { %2128 = sst [smem:[#allocation16_spill]] %s2117_s0 }
   0x2   :  { %2129 = sst [smem:[#allocation17_spill]] %s2119_s2 }
   0x3   :  { %2130 = sst [smem:[#allocation18_spill]] %s2120_s3 }
   0x4   :  { %10 = vsyncpa [#allocation3], 0 }
   0x5   :  { %12 = vsyncpa [#allocation3 + $0x1], 0 }
   0x6   :  { %13 = vsyncpa [#allocation6], 0 }
   0x7   :  { %15 = vsyncpa [#allocation6 + $0x1], 0 }
   0x8   :  { %16 = vsyncpa [#allocation9], 0 }
   0x9   :  { %17 = vsyncpa [#allocation4], 0 }
   0xa   :  { %19 = vsyncpa [#allocation4 + $0x1], 0  ;;  %s1678_s18 = smov 0   ;;  %s1680_s19 = smov 0  }
   0xb   :  { %s1682_s20 = smov 0   ;;  %s1684_s21 = smov 0  }
   0xc LB: > { %s1699_s22 = sadd.s32 4294967295, %s1635_s21   ;;  %s1220_s23 = sadd.s32 4294967294, %s1635_s21   ;;  %s1635_s21 = sphi %s1684_s21, %s2155_s21   ;;  %s1631_s20 = sphi %s1682_s20, %s2154_s20   ;;  %s1627_s19 = sphi %s1680_s19, %s2153_s19   ;;  %s1623_s18 = sphi %s1678_s18, %s2152_s18  }
   0xd   : > { %p45_p0 = scmp.ne.s32.totalorder %s1627_s19, %s1623_s18  ;;  %p2124_p1 = scmp.eq.s32.totalorder %s1699_s22, 0 }
   0xe   : > { %p158_p2 = scmp.eq.s32.totalorder %s1699_s22, 1  ;;  %p164_p3 = scmp.eq.s32.totalorder %s1220_s23, 1 }
   0xf   : > { %p1708_p4 = por %p2124_p1, %p45_p0  ;;  %p1221_p5 = scmp.ge.s32.totalorder %s1635_s21, 1 }
  0x10   : > { %p1713_p6 = por %p164_p3, %p45_p0  ;;  %p171_p7 = scmp.lt.s32.totalorder %s1635_s21, 3 }
  0x11   : > { %s2131_s24 = scalar_select %p1708_p4, 1, 0 }
  0x12   : > { %s2132_s25 = scalar_select %p1713_p6, 1, 0 }
  0x13   : > { %p1718_p8 = pnand %p1221_p5, %p171_p7  ;;  %s1637_s27 = smov [#allocation7]  }
  0x14   : > { %s183_s28 = sshll.u32 %s1637_s27, 4  ;;  %s1638_s30 = smov [#allocation8]   ;;  %s184_s28 = int_to_ptr.vmem [resolvable:$true] %s183_s28 }
  0x15   : > { %s2133_s26 = scalar_select %p1718_p8, 1, 0 }
  0x16   : > { %p1321_p9 = pneg %p1718_p8  ;;  %s196_s6 = sshll.u32 %s1638_s30, 4  ;;  %s197_s6 = int_to_ptr.vmem [resolvable:$true] %s196_s6 }
  0x17   : > { %s1462_s7 = scalar_lea.vmem %s184_s28, 512  ;;  %p1470_p5 = scmp.lt.s32.totalorder %s184_s28, %s184_s28 }
  0x18   : > { %p1727_p11 = pnand %p1321_p9, %p2124_p1  ;;  %p1463_p13 = scmp.ne.s32.totalorder %s184_s28, %s1462_s7 }
  0x19   : > { %p1471_p7 = scmp.lt.s32.totalorder %s1462_s7, %s1462_s7 }
  0x1a   : > { %p1453_p12 = pneg %p1727_p11 }
  0x1b   : > { %p1472_p10 = por %p1471_p7, %p1470_p5 }
  0x1c   : > { %p1465_p0 = pnand %p1463_p13, %p1453_p12 }
  0x1e   : > { %p1466_p3 = pneg %p1465_p0 }
  0x20   : > { %p1473_p9 = pnand %p1472_p10, %p1466_p3 }
  0x22   : > { %1476 = shalt.err (!%p1473_p9)
}
  0x23   : > { %s2123_s8 = smov 128   ;;  %s1640_s9 = smov 8  }
  0x24   : > { %s2135_s2 = sld [smem:[#allocation17_spill]]  ;;  %s1488_s12 = scalar_lea.vmem %s197_s6, 512 }
  0x25   : > { %p1489_p13 = scmp.ne.s32.totalorder %s197_s6, %s1488_s12  ;;  %p1496_p10 = scmp.lt.s32.totalorder %s197_s6, %s197_s6 }
  0x26   : > { %p1497_p3 = scmp.lt.s32.totalorder %s1488_s12, %s1488_s12 }
  0x27   : > { %p1491_p0 = pnand %p1489_p13, %p1453_p12 }
  0x28   : > { %p1498_p7 = por %p1497_p3, %p1496_p10 }
  0x29   : > { %p1492_p5 = pneg %p1491_p0 }
  0x2a   : > { %1324 = dma.hbm_to_vmem [thread:$0]  (!%p1727_p11), %s2135_s2, 512, %s184_s28, [#allocation6], %s2123_s8, %s2123_s8, %s1640_s9  }
  0x2b   : > { %p1499_p9 = pnand %p1498_p7, %p1492_p5 }
  0x2d   : > { %1502 = shalt.err (!%p1499_p9)
}
  0x2e   : > { %s2136_s3 = sld [smem:[#allocation18_spill]]  ;;  %s1756_s15 = sadd.s32 1, %s1635_s21  }
  0x2f   : > { %s32_s16 = sadd.s32 1, %s1631_s20  ;;  %s29_s17 = ssub.s32 %s1635_s21, %s1756_s15 }
  0x30   : > { %p39_p12 = scmp.ne.s32.totalorder %s1631_s20, %s1627_s19  ;;  %p30_p13 = scmp.eq.s32.totalorder %s29_s17, 0 }
  0x31   : > { %p40_p0 = scmp.eq.s32.totalorder %s1635_s21, 0  ;;  %p1341_p10 = scmp.lt.s32.totalorder %s1635_s21, 2 }
  0x32   : > { %p1766_p5 = por %p158_p2, %p39_p12  ;;  %s1775_s28 = sand.u32 1, %s1631_s20  }
  0x33   : > { %s1772_s27 = scalar_select %p30_p13, %s1631_s20, %s32_s16  }
  0x34   : > { %1327 = dma.hbm_to_vmem [thread:$0]  (!%p1727_p11), %s2136_s3, 512, %s197_s6, [#allocation9], %s2123_s8, %s2123_s8, %s1640_s9  }
  0x35   : > { %s2137_s23 = scalar_select %p1766_p5, 1, 0 }
  0x36   : > { %p41_p3 = por %p40_p0, %p39_p12  ;;  %s1225_s29 = sshll.u32 %s1775_s28, 6 }
  0x37   : > { %s1258_s30 = sshll.u32 %s1635_s21, 10  ;;  %s2138_s0 = sld [smem:[#allocation16_spill]] }
  0x38   : > { %s217_s11 = scalar_lea.vmem [#allocation2], %s1225_s29  ;;  %p1786_p2 = pnand %p1341_p10, %p41_p3 }
  0x39   : > { %s224_s12 = sshll.u32 %s217_s11, 4  ;;  %s214_s17 = scalar_lea.sflag [#allocation3], %s1775_s28  ;;  %s1784_s12 = int_to_ptr.vmem [resolvable:$true] %s224_s12 }
  0x3a   : > { %p1505_p7 = pneg %p1786_p2 }
  0x3d   : > { %s1782_s10 = scalar_lea.hbm %s2138_s0, %s1258_s30  ;;  %s1508_s6 = scalar_lea.hbm %s2138_s0, 2048 }
  0x3e   : > { %s1503_s8 = scalar_lea.hbm %s1782_s10, 1024  ;;  %p1509_p13 = scmp.lt.s32.totalorder %s1782_s10, %s2138_s0 }
  0x3f   : > { %p1504_p11 = scmp.ne.s32.totalorder %s1782_s10, %s1503_s8  ;;  %p1510_p0 = scmp.lt.s32.totalorder %s1508_s6, %s1503_s8 }
  0x41   : > { %p1506_p9 = pnand %p1505_p7, %p1504_p11  ;;  %p1511_p10 = por %p1510_p0, %p1509_p13 }
  0x43   : > { %p1507_p12 = pneg %p1506_p9 }
  0x45   : > { %p1512_p3 = pnand %p1511_p10, %p1507_p12 }
  0x47   : > { %1515 = shalt.err (!%p1512_p3)
}
  0x48   : > { %s1516_s14 = scalar_lea.vmem %s1784_s12, 1024  ;;  %s1641_s29 = smov [#allocation2]  }
  0x49   : > { %p1517_p1 = scmp.ne.s32.totalorder %s1784_s12, %s1516_s14  ;;  %s1521_s30 = sshll.u32 %s1641_s29, 4  ;;  %s1522_s30 = int_to_ptr.vmem [resolvable:$false] %s1521_s30 }
  0x4a   : > { %s1523_s16 = scalar_lea.vmem %s1522_s30, 2048  ;;  %p1524_p6 = scmp.lt.s32.totalorder %s1784_s12, %s1522_s30 }
  0x4b   : > { %p1519_p11 = pnand %p1517_p1, %p1505_p7  ;;  %p1525_p5 = scmp.lt.s32.totalorder %s1523_s16, %s1516_s14 }
  0x4d   : > { %p1520_p9 = pneg %p1519_p11  ;;  %p1526_p4 = por %p1525_p5, %p1524_p6 }
  0x4f   : > { %p1527_p13 = pnand %p1526_p4, %p1520_p9 }
  0x51   : > { %1530 = shalt.err (!%p1527_p13)
}
  0x52   : > { %s2140_s8 = smov 128   ;;  %s1229_s6 = sshll.u32 %s1635_s21, 7 }
  0x53   : > { %1331 = dma.hbm_to_vmem [thread:$0]  (!%p1786_p2), %s1782_s10, 1024, %s1784_s12, %s214_s17, %s2140_s8, %s2140_s8, %s1640_s9  }
  0x54   : > { %s1826_s16 = scalar_lea.hbm %s2118_s1, %s1229_s6  ;;  %s2141_s11 = sshll.u32 %s1775_s28, 3 }
  0x55   : > { %s238_s29 = scalar_lea.vmem [#allocation5], %s2141_s11  ;;  %s2142_s0 = sand.u32 1, %s1635_s21  }
  0x56   : > { %s245_s30 = sshll.u32 %s238_s29, 4  ;;  %s235_s2 = scalar_lea.sflag [#allocation6], %s2142_s0  ;;  %s246_s30 = int_to_ptr.vmem [resolvable:$true] %s245_s30 }
  0x57   : > { %s1531_s3 = scalar_lea.hbm %s1826_s16, 128  ;;  %s1536_s12 = scalar_lea.hbm %s2118_s1, 256 }
  0x58   : > { %p1532_p1 = scmp.ne.s32.totalorder %s1826_s16, %s1531_s3  ;;  %p1537_p5 = scmp.lt.s32.totalorder %s1826_s16, %s2118_s1 }
  0x59   : > { %p1538_p12 = scmp.lt.s32.totalorder %s1536_s12, %s1531_s3 }
  0x5a   : > { %p1534_p4 = pnand %p1532_p1, %p1505_p7 }
  0x5b   : > { %p1539_p0 = por %p1538_p12, %p1537_p5 }
  0x5c   : > { %p1535_p6 = pneg %p1534_p4 }
  0x5e   : > { %p1540_p10 = pnand %p1539_p0, %p1535_p6 }
  0x60   : > { %1543 = shalt.err (!%p1540_p10)
}
  0x61   : > { %s1544_s8 = scalar_lea.vmem %s246_s30, 128  ;;  %s1642_s0 = smov [#allocation5]  }
  0x62   : > { %p1545_p3 = scmp.ne.s32.totalorder %s246_s30, %s1544_s8  ;;  %s1549_s6 = sshll.u32 %s1642_s0, 4  ;;  %s1550_s6 = int_to_ptr.vmem [resolvable:$false] %s1549_s6 }
  0x63   : > { %s1551_s7 = scalar_lea.vmem %s1550_s6, 256  ;;  %p1552_p13 = scmp.lt.s32.totalorder %s246_s30, %s1550_s6 }
  0x64   : > { %p1547_p11 = pnand %p1545_p3, %p1505_p7  ;;  %p1553_p1 = scmp.lt.s32.totalorder %s1551_s7, %s1544_s8 }
  0x66   : > { %p1548_p9 = pneg %p1547_p11  ;;  %p1554_p4 = por %p1553_p1, %p1552_p13 }
  0x68   : > { %p1555_p8 = pnand %p1554_p4, %p1548_p9 }
  0x6a   : > { %1558 = shalt.err (!%p1555_p8)
}
  0x6b   : > { %1334 = dma.hbm_to_vmem [thread:$0]  (!%p1786_p2), %s1826_s16, 128, %s246_s30, %s235_s2  }
  0x6c   : > { %p2143_p6 = scmp.ne.s32.totalorder %s2133_s26, 0 }
  0x6d   : > { %s1853_s3 = sand.u32 (!%p2143_p6), 1, %s1627_s19   ;;  %p2144_p7 = scmp.ne.s32.totalorder (!%p2143_p6), %s2131_s24, 0 }
  0x6e   : > { %254 = sbr.rel (%p2143_p6) target bundleno = 1176 (0x498), region = 40  ;;  %s1231_s14 = sshll.u32 (!%p2143_p6), %s1853_s3, 6 }
  0x6f   : > { %s257_s11 = scalar_lea.sflag (!%p2143_p6), [#allocation3], %s1853_s3  ;;  %s1857_s29 = scalar_lea.vmem (!%p2143_p6), [#allocation2], %s1231_s14 }
  0x73   : > { %1602 = dma.done.wait (%p2144_p7), %s257_s11, 1024  }
  0x74   : > { %1604 = vsyncadd (%p2144_p7), %s257_s11, 4294966272  ;;  %s265_s2 = sand.u32 1, %s1699_s22   ;;  %s1232_s26 = sshll.u32 %s1853_s3, 3 }
  0x75   : > { %s266_s13 = scalar_lea.sflag [#allocation6], %s265_s2  ;;  %s1867_s16 = scalar_lea.vmem [#allocation5], %s1232_s26 }
  0x76   : > { %1606 = dma.done.wait (%p2144_p7), %s266_s13, 128  }
  0x77   : > { %1608 = vsyncadd (%p2144_p7), %s266_s13, 4294967168  ;;  %p2145_p8 = scmp.eq.s32.totalorder %s1699_s22, 0 }
  0x79   : > { %1610 = dma.done.wait (%p2145_p8), [#allocation6], 512   ;;  %p2146_p2 = pmov %p2145_p8 }
  0x7b   : > { %1612 = vsyncadd (%p2146_p2), [#allocation6], 4294966784  ;;  %p2147_p5 = pmov %p2146_p2 }
  0x7c   : > { %p2148_p12 = pmov %p2146_p2 }
  0x7d   : > { %1614 = dma.done.wait (%p2147_p5), [#allocation9], 512  }
  0x7e   : > { %1616 = vsyncadd (%p2148_p12), [#allocation9], 4294966784  ;;  %v1643_v0 = vmov 0.0   ;;  %vm1644_vm0 = vmmov 0   ;;  %v321_v1 = vld [vmem:[#allocation7 + $0x18] sm:$0xff]  ;;  %v320_v3 = vld [vmem:[#allocation7 + $0x10] sm:$0xff]  ;;  %v535_v20 = vlaneseq }
  0x7f   : > { %1296 = vmatprep.subr.mxu1 %v1643_v0  ;;  %1304 = vmatprep.mubr.msk.f32.mxu1 %vm1644_vm0, %v1643_v0  ;;  %v456_v2 = vld [vmem:[#allocation8 + $0x18] sm:$0xff]  ;;  %v455_v4 = vld [vmem:[#allocation8 + $0x10] sm:$0xff]  ;;  %v319_v5 = vld [vmem:[#allocation7 + $0x8] sm:$0xff]  ;;  %vm322_vm1 = vcmask 261120   ;;  %v1645_v18 = vmov 1966171168  }
  0x80   : > { %1276 = vmatprep.subr.mxu0 %v321_v1  ;;  %1297 = vmatpush3.msra.mxu1 %v456_v2  ;;  %v454_v6 = vld [vmem:[#allocation8 + $0x8] sm:$0xff]  ;;  %v318_v7 = vld [vmem:[#allocation7] sm:$0xff]  ;;  %v1882_v9 = vld [vmem:[%s1857_s29] sm:$0xff]  ;;  %v533_v19 = vunpack.c.l.s4 %v1645_v18  ;;  %v1924_v22 = vshrl.u32 %v535_v20, 7  ;;  %vm757_vm2 = vcmask 1041409   ;;  %vm759_vm3 = vcmask 1042434  }
  0x81   : > { %1277 = vmatpush3.msra.mxu0 %v321_v1  ;;  %1298 = vmatprep.subr.mxu1 %v1643_v0  ;;  %v453_v8 = vld [vmem:[#allocation8] sm:$0xff]  ;;  %v452_v10 = vld [vmem:[%s1867_s16] sm:$0xff]  ;;  %v1899_v13 = vld [vmem:[%s1857_s29 + $0x18] sm:$0xff]  ;;  %vm761_vm4 = vcmask 1043459   ;;  %vm763_vm5 = vcmask 1044484   ;;  %vm765_vm6 = vcmask 1045509  }
  0x82   : > { %1278 = vmatprep.subr.mxu0 %v320_v3  ;;  %1299 = vmatpush3.msra.mxu1 %v455_v4  ;;  %v1886_v11 = vld [vmem:[%s1857_s29 + $0x8] sm:$0xff]  ;;  %v1889_v12 = vld [vmem:[%s1857_s29 + $0x10] sm:$0xff]  ;;  %v1902_v14 = vld [vmem:[%s1857_s29 + $0x20] sm:$0xff]  ;;  %v534_v21 = vunpack.c.0.s8 %v533_v19  ;;  %v1928_v28 = vsub.s32 0, %v1924_v22  ;;  %vm767_vm7 = vcmask 1046534   ;;  %vm769_vm8 = vcmask 1047559  }
  0x83   : > { %1279 = vmatpush3.msra.mxu0 %v320_v3  ;;  %1300 = vmatprep.subr.mxu1 %v1643_v0  ;;  %v1909_v15 = vld [vmem:[%s1857_s29 + $0x28] sm:$0xff]  ;;  %v1912_v16 = vld [vmem:[%s1857_s29 + $0x30] sm:$0xff]  ;;  %v1919_v17 = vld [vmem:[%s1857_s29 + $0x38] sm:$0xff]  ;;  %vm772_vm9 = vcmask 64512   ;;  %s1255_s9 = sshll.u32 %s1699_s22, 7  ;;  %s308_s10 = scalar_lea.vmem [#allocation10], %s1232_s26 }
  0x84   : > { %1280 = vmatprep.subr.mxu0 %v319_v5  ;;  %1301 = vmatpush3.msra.mxu1 %v454_v6  ;;  %v537_v23 = vsub.s32 %v534_v21, %v1924_v22  ;;  %s1108_s12 = sshll.u32 %s308_s10, 4  ;;  %s2078_s8 = scalar_lea.hbm %s2122_s5, %s1255_s9  ;;  %s1109_s12 = int_to_ptr.vmem [resolvable:$true] %s1108_s12 }
  0x85   : > { %1281 = vmatpush3.msra.mxu0 %v319_v5  ;;  %1302 = vmatprep.subr.mxu1 %v1643_v0  ;;  %s1095_s22 = scalar_lea.sflag [#allocation4], %s1853_s3  ;;  %s1559_s0 = scalar_lea.vmem %s1109_s12, 128 }
  0x86   : > { %1282 = vmatprep.subr.mxu0 %v318_v7  ;;  %1303 = vmatpush3.msra.mxu1 %v453_v8  ;;  %p1560_p0 = scmp.ne.s32.totalorder %s1109_s12, %s1559_s0  ;;  %p2149_p10 = scmp.ne.s32.totalorder %s2137_s23, 0 }
  0x87   : > { %1283 = vmatpush3.msra.mxu0 %v318_v7  ;;  %1284 = vmatprep.mubr.msk.f32.mxu0 %vm322_vm1, %v1882_v9  ;;  %s1647_s6 = smov [#allocation10]  }
  0x88   : > { %1305 = vmatmul.mubr.msk.f32.vlgmr.msra.gmra.mxu1 %vm322_vm1, %v452_v10  ;;  %1285 = vmatmul.mubr.msk.f32.vlgmr.msra.gmra.mxu0 %vm322_vm1, %v1886_v11  ;;  %p1561_p3 = pnand %p1560_p0, %p2149_p10  ;;  %s1563_s7 = sshll.u32 %s1647_s6, 4  ;;  %s1564_s7 = int_to_ptr.vmem [resolvable:$false] %s1563_s7 }
  0x89   : > { %1287 = vmatprep.mubr.msk.f32.mxu0 %vm322_vm1, %v1889_v12  ;;  %s1565_s14 = scalar_lea.vmem %s1564_s7, 256  ;;  %p1566_p9 = scmp.lt.s32.totalorder %s1109_s12, %s1564_s7 }
  0x8a   : > { %p1562_p11 = pneg %p1561_p3  ;;  %p1567_p13 = scmp.lt.s32.totalorder %s1565_s14, %s1559_s0 }
  0x8c   : > { %1288 = vmatmul.mubr.msk.f32.gmra.mxu0 %vm322_vm1, %v1899_v13  ;;  %p1568_p1 = por %p1567_p13, %p1566_p9 }
  0x8d   : > { %1290 = vmatprep.mubr.msk.f32.mxu0 %vm322_vm1, %v1902_v14 }
  0x8e   : > { %p1569_p4 = pnand %p1568_p1, %p1562_p11 }
  0x90   : > { %1291 = vmatmul.mubr.msk.f32.gmra.mxu0 %vm322_vm1, %v1909_v15 }
  0x91   : > { %1293 = vmatprep.mubr.msk.f32.mxu0 %vm322_vm1, %v1912_v16 }
  0x94   : > { %1294 = vmatmul.mubr.msk.f32.gmra.mxu0 %vm322_vm1, %v1919_v17 }
 0x148   : > { %v526_v24 = vpop.f32.mrf.mxu1  ;;  %v1286_v25 = vpop.f32.mrf.mxu0 }
 0x149   : > { %v531_v26 = vcombine.high %v526_v24, %v526_v24  ;;  %v538_v27 = vrot.slane %v526_v24, %v537_v23 }
 0x14a   : > { %v1306_v29 = vpop.f32.mrf.mxu1  ;;  %v413_v30 = vpop.f32.mrf.mxu0 }
 0x14b   : > { %v545_v31 = vrot.slane %v531_v26, %v537_v23  ;;  %v546_v32 = vcombine.high %v538_v27, %v538_v27  ;;  %v554_v33 = vrot.slane %v538_v27, %v537_v23 }
 0x14c   : > { %v1289_v34 = vpop.f32.mrf.mxu0 }
 0x14d   : > { %v547_v35 = vcombine.high %v545_v31, %v545_v31  ;;  %v568_v36 = vrot.slane %v546_v32, %v537_v23  ;;  %v583_v37 = vrot.slane %v554_v33, %v1928_v28  ;;  %v576_v38 = vcombine.high %v554_v33, %v554_v33 }
 0x14e   : > { %v423_v39 = vpop.f32.mrf.mxu0  ;;  %v561_v40 = vrot.slane %v545_v31, %v537_v23 }
 0x14f   : > { %v587_v41 = vrot.slane %v568_v36, %v1928_v28  ;;  %v620_v42 = vadd.f32 %v583_v37, %v413_v30  ;;  %v578_v43 = vcombine.high %v568_v36, %v568_v36  ;;  %v591_v44 = vrot.slane %v576_v38, %v1928_v28 }
 0x150   : > { %v1292_v45 = vpop.f32.mrf.mxu0  ;;  %v575_v46 = vrot.slane %v547_v35, %v537_v23  ;;  %v577_v47 = vcombine.high %v561_v40, %v561_v40  ;;  %v599_v54 = vrot.slane %v561_v40, %v1928_v28  ;;  %v1253_v35 = vld [vmem:[%s2121_s4] ss:$0 sm:$0xff] }
 0x151   : > { %v621_v48 = vadd.f32 %v1286_v25, %v587_v41  ;;  %v1245_v49 = vmul.f32 -1.442695, %v620_v42  ;;  %v595_v50 = vrot.slane %v578_v43, %v1928_v28  ;;  %v622_v51 = vadd.f32 %v591_v44, %v423_v39 }
 0x152   : > { %v603_v52 = vrot.slane %v575_v46, %v1928_v28  ;;  %v433_v53 = vpop.f32.mrf.mxu0  ;;  %v579_v55 = vcombine.high %v575_v46, %v575_v46  ;;  %v607_v0 = vrot.slane %v577_v47, %v1928_v28 }
 0x153   : > { %v1246_v56 = vmul.f32 -1.442695, %v621_v48  ;;  %1387 = vpow2.f32 %v1245_v49  ;;  %v623_v57 = vadd.f32 %v1289_v34, %v595_v50  ;;  %v1247_v58 = vmul.f32 -1.442695, %v622_v51 }
 0x154   : > { %v625_v59 = vadd.f32 %v1292_v45, %v603_v52  ;;  %v624_v60 = vadd.f32 %v599_v54, %v433_v53  ;;  %v1295_v61 = vpop.f32.mrf.mxu0  ;;  %v611_v62 = vrot.slane %v579_v55, %v1928_v28 }
 0x155   : > { %1389 = vpow2.f32 %v1246_v56  ;;  %v1248_v63 = vmul.f32 -1.442695, %v623_v57 }
 0x156   : > { %1391 = vpow2.f32 %v1247_v58  ;;  %v1250_v1 = vmul.f32 -1.442695, %v625_v59  ;;  %v1249_v2 = vmul.f32 -1.442695, %v624_v60  ;;  %v627_v3 = vadd.f32 %v1295_v61, %v611_v62  ;;  %v443_v4 = vpop.f32.mrf.mxu0 }
 0x157   : > { %1393 = vpow2.f32 %v1248_v63  ;;  %v626_v5 = vadd.f32 %v607_v0, %v443_v4  ;;  %v724_v60 = vand.u32 127, %v535_v20 }
 0x158   : > { %1395 = vpow2.f32 %v1250_v1  ;;  %v1252_v6 = vmul.f32 -1.442695, %v627_v3 }
 0x159   : > { %1397 = vpow2.f32 %v1249_v2  ;;  %v1251_v7 = vmul.f32 -1.442695, %v626_v5  ;;  %v1951_v62 = vsub.s32 %v724_v60, %v1924_v22 }
 0x15a   : > { %1399 = vpow2.f32 %v1252_v6 }
 0x15b   : > { %1401 = vpow2.f32 %v1251_v7 }
 0x160   : > { %v1388_v8 = vpop.eup %1387 }
 0x161   : > { %v652_v10 = vadd.f32 1.0, %v1388_v8 }
 0x162   : > { %v1390_v18 = vpop.eup %1389 }
 0x163   : > { %v1392_v19 = vpop.eup %1391  ;;  %v653_v21 = vadd.f32 1.0, %v1390_v18  ;;  %1403 = vrcp.f32 %v652_v10 }
 0x164   : > { %v1394_v23 = vpop.eup %1393  ;;  %v654_v24 = vadd.f32 1.0, %v1392_v19 }
 0x165   : > { %v1396_v25 = vpop.eup %1395  ;;  %1405 = vrcp.f32 %v653_v21  ;;  %v655_v26 = vadd.f32 1.0, %v1394_v23 }
 0x166   : > { %v1398_v27 = vpop.eup %1397  ;;  %1407 = vrcp.f32 %v654_v24  ;;  %v657_v29 = vadd.f32 1.0, %v1396_v25 }
 0x167   : > { %v1400_v30 = vpop.eup %1399  ;;  %1409 = vrcp.f32 %v655_v26  ;;  %v656_v31 = vadd.f32 1.0, %v1398_v27 }
 0x168   : > { %v1402_v32 = vpop.eup %1401  ;;  %v659_v34 = vadd.f32 1.0, %v1400_v30 }
 0x169   : > { %1411 = vrcp.f32 %v656_v31  ;;  %v658_v33 = vadd.f32 1.0, %v1402_v32  ;;  %v1646_v32 = vmov 0  }
 0x16a   : > { %1413 = vrcp.f32 %v657_v29  ;;  %1386 = vset.pattern.permute.xlu0 %v1646_v32  ;;  %1385 = vset.pattern.permute.xlu1 %v1646_v32 }
 0x16b   : > { %1415 = vrcp.f32 %v658_v33  ;;  %v783_v33 = vsub.s32 1, %v1924_v22 }
 0x16c   : > { %1417 = vrcp.f32 %v659_v34  ;;  %v787_v34 = vsub.s32 2, %v1924_v22 }
 0x170   : > { %v1404_v36 = vpop.eup %1403 }
 0x171   : > { %v683_v37 = vmul.f32 %v1404_v36, %v1253_v35 }
 0x172   : > { %v1406_v38 = vpop.eup %1405 }
 0x173   : > { %v1408_v39 = vpop.eup %1407  ;;  %v691_v40 = vsel %vm322_vm1, %v683_v37, 0.0  ;;  %v684_v41 = vmul.f32 %v1406_v38, %v1253_v35 }
 0x174   : > { %v1410_v42 = vpop.eup %1409  ;;  %692 = vadd.xlane.f32.xlu0 %v691_v40  ;;  %v685_v43 = vmul.f32 %v1408_v39, %v1253_v35  ;;  %v795_v40 = vsub.s32 4, %v1924_v22 }
 0x175   : > { %v686_v46 = vmul.f32 %v1410_v42, %v1253_v35  ;;  %v694_v48 = vsel %vm322_vm1, %v684_v41, 0.0 }
 0x176   : > { %v1412_v44 = vpop.eup %1411  ;;  %v697_v45 = vsel %vm322_vm1, %v685_v43, 0.0 }
 0x177   : > { %v1414_v47 = vpop.eup %1413  ;;  %698 = vadd.xlane.f32.xlu1 %v697_v45  ;;  %v687_v49 = vmul.f32 %v1412_v44, %v1253_v35  ;;  %v700_v51 = vsel %vm322_vm1, %v686_v46, 0.0 }
 0x178   : > { %v1416_v50 = vpop.eup %1415  ;;  %695 = vadd.xlane.f32.xlu0 %v694_v48  ;;  %v688_v52 = vmul.f32 %v1414_v47, %v1253_v35  ;;  %v799_v47 = vsub.s32 5, %v1924_v22 }
 0x179   : > { %v1418_v53 = vpop.eup %1417  ;;  %v703_v54 = vsel %vm322_vm1, %v687_v49, 0.0  ;;  %v689_v55 = vmul.f32 %v1416_v50, %v1253_v35 }
 0x17a   : > { %v706_v56 = vsel %vm322_vm1, %v688_v52, 0.0  ;;  %v690_v57 = vmul.f32 %v1418_v53, %v1253_v35  ;;  %v791_v35 = vsub.s32 3, %v1924_v22 }
 0x17b   : > { %701 = vadd.xlane.f32.xlu1 %v700_v51  ;;  %v709_v58 = vsel %vm322_vm1, %v689_v55, 0.0  ;;  %v803_v51 = vsub.s32 6, %v1924_v22  ;;  %v807_v55 = vsub.s32 7, %v1924_v22 }
 0x17c   : > { %704 = vadd.xlane.f32.xlu0 %v703_v54  ;;  %v712_v59 = vsel %vm322_vm1, %v690_v57, 0.0 }
 0x17f   : > { %707 = vadd.xlane.f32.xlu1 %v706_v56 }
 0x180   : > { %710 = vadd.xlane.f32.xlu0 %v709_v58 }
 0x183   : > { %713 = vadd.xlane.f32.xlu1 %v712_v59 }
 0x1fd   : > { %v693_v61 = vpop.xlane.xlu0 %692 }
 0x1fe   : > { %v728_v1 = vrot.slane %v693_v61, %v1951_v62 }
 0x200   : > { %v699_v63 = vpop.xlane.xlu1 %698 }
 0x201   : > { %v696_v0 = vpop.xlane.xlu0 %695  ;;  %v736_v3 = vrot.slane %v699_v63, %v1951_v62 }
 0x202   : > { %v732_v2 = vrot.slane %v696_v0, %v1951_v62 }
 0x204   : > { %v758_v4 = vsel %vm757_vm2, %v732_v2, %v728_v1  ;;  %v702_v5 = vpop.xlane.xlu1 %701 }
 0x205   : > { %v760_v20 = vsel %vm759_vm3, %v736_v3, %v758_v4  ;;  %v740_v6 = vrot.slane %v702_v5, %v1951_v62  ;;  %v705_v7 = vpop.xlane.xlu0 %704 }
 0x206   : > { %v744_v8 = vrot.slane %v705_v7, %v1951_v62 }
 0x207   : > { %v762_v10 = vsel %vm761_vm4, %v740_v6, %v760_v20 }
 0x208   : > { %v764_v18 = vsel %vm763_vm5, %v744_v8, %v762_v10  ;;  %v708_v19 = vpop.xlane.xlu1 %707 }
 0x209   : > { %v748_v21 = vrot.slane %v708_v19, %v1951_v62  ;;  %v711_v23 = vpop.xlane.xlu0 %710 }
 0x20a   : > { %v752_v24 = vrot.slane %v711_v23, %v1951_v62 }
 0x20b   : > { %v766_v25 = vsel %vm765_vm6, %v748_v21, %v764_v18 }
 0x20c   : > { %v714_v26 = vpop.xlane.xlu1 %713  ;;  %v768_v27 = vsel %vm767_vm7, %v752_v24, %v766_v25 }
 0x20d   : > { %v756_v29 = vrot.slane %v714_v26, %v1951_v62 }
 0x20f   : > { %v770_v30 = vsel %vm769_vm8, %v756_v29, %v768_v27 }
 0x210   : > { %v773_v31 = vsel %vm772_vm9, %v770_v30, -inf }
 0x211   : > { %774 = vmax.xlane.f32.xlu0 %v773_v31 }
 0x29a   : > { %v775_v36 = vpop.xlane.xlu0 %774 }
 0x29b   : > { %v780_v37 = vrot.slane %v775_v36, %v1928_v28  ;;  %v784_v38 = vrot.slane %v775_v36, %v783_v33  ;;  %v788_v39 = vrot.slane %v775_v36, %v787_v34  ;;  %v792_v41 = vrot.slane %v775_v36, %v791_v35 }
 0x29c   : > { %v796_v48 = vrot.slane %v775_v36, %v795_v40  ;;  %v800_v52 = vrot.slane %v775_v36, %v799_v47  ;;  %v804_v56 = vrot.slane %v775_v36, %v803_v51  ;;  %v808_v59 = vrot.slane %v775_v36, %v807_v55 }
 0x29d   : > { %v817_v42 = vsub.f32 %v693_v61, %v780_v37  ;;  %v818_v43 = vsub.f32 %v696_v0, %v784_v38  ;;  %v819_v44 = vsub.f32 %v699_v63, %v788_v39  ;;  %v820_v49 = vsub.f32 %v702_v5, %v792_v41 }
 0x29e   : > { %v821_v53 = vsub.f32 %v705_v7, %v796_v48  ;;  %v822_v57 = vsub.f32 %v708_v19, %v800_v52  ;;  %v823_v60 = vsub.f32 %v711_v23, %v804_v56  ;;  %v824_v1 = vsub.f32 %v714_v26, %v808_v59 }
 0x29f   : > { %v825_v45 = vmul.f32 1.442695, %v817_v42  ;;  %v827_v46 = vmul.f32 1.442695, %v818_v43  ;;  %v829_v50 = vmul.f32 1.442695, %v819_v44 }
 0x2a0   : > { %v831_v54 = vmul.f32 1.442695, %v820_v49  ;;  %v833_v58 = vmul.f32 1.442695, %v821_v53  ;;  %v835_v61 = vmul.f32 1.442695, %v822_v57 }
 0x2a1   : > { %1419 = vpow2.f32 %v825_v45  ;;  %v837_v2 = vmul.f32 1.442695, %v823_v60  ;;  %v839_v4 = vmul.f32 1.442695, %v824_v1 }
 0x2a2   : > { %1421 = vpow2.f32 %v827_v46 }
 0x2a3   : > { %1423 = vpow2.f32 %v829_v50 }
 0x2a4   : > { %1425 = vpow2.f32 %v831_v54 }
 0x2a5   : > { %1427 = vpow2.f32 %v833_v58 }
 0x2a6   : > { %1429 = vpow2.f32 %v835_v61 }
 0x2a7   : > { %1431 = vpow2.f32 %v837_v2 }
 0x2a8   : > { %1433 = vpow2.f32 %v839_v4 }
 0x2ae   : > { %v1420_v63 = vpop.eup %1419 }
 0x2af   : > { %v1991_v0 = vpop.eup %1421  ;;  %850 = vperm.xlu1 %1385, %v1420_v63  }
 0x2b0   : > { %853 = vperm.xlu0 %1386, %v1991_v0   ;;  %v1994_v3 = vpop.eup %1423 }
 0x2b1   : > { %v1997_v5 = vpop.eup %1425 }
 0x2b2   : > { %v2000_v20 = vpop.eup %1427 }
 0x2b3   : > { %856 = vperm.xlu1 %1385, %v1994_v3   ;;  %v2003_v6 = vpop.eup %1429 }
 0x2b4   : > { %v2006_v7 = vpop.eup %1431 }
 0x2b5   : > { %v2009_v8 = vpop.eup %1433 }
 0x2b7   : > { %859 = vperm.xlu1 %1385, %v1997_v5  }
 0x2bb   : > { %862 = vperm.xlu1 %1385, %v2000_v20  }
 0x2bf   : > { %865 = vperm.xlu1 %1385, %v2003_v6  }
 0x2c3   : > { %868 = vperm.xlu1 %1385, %v2006_v7  }
 0x2c7   : > { %871 = vperm.xlu1 %1385, %v2009_v8  }
 0x32a   : > { %v851_v10 = vpop.permute.xlu1 %850 }
 0x32b   : > { %v854_v23 = vpop.permute.xlu0 %853  ;;  %v876_v26 = vrot.slane %v851_v10, %v1951_v62 }
 0x32c   : > { %v880_v25 = vrot.slane %v854_v23, %v1951_v62 }
 0x32e   : > { %v857_v18 = vpop.permute.xlu1 %856  ;;  %v905_v32 = vsel %vm757_vm2, %v880_v25, %v876_v26 }
 0x32f   : > { %v884_v27 = vrot.slane %v857_v18, %v1951_v62 }
 0x331   : > { %v906_v37 = vsel %vm759_vm3, %v884_v27, %v905_v32 }
 0x332   : > { %v860_v19 = vpop.permute.xlu1 %859 }
 0x333   : > { %v888_v29 = vrot.slane %v860_v19, %v1951_v62 }
 0x335   : > { %v907_v39 = vsel %vm761_vm4, %v888_v29, %v906_v37 }
 0x336   : > { %v863_v21 = vpop.permute.xlu1 %862 }
 0x337   : > { %v892_v30 = vrot.slane %v863_v21, %v1951_v62 }
 0x339   : > { %v908_v41 = vsel %vm763_vm5, %v892_v30, %v907_v39 }
 0x33a   : > { %v866_v24 = vpop.permute.xlu1 %865 }
 0x33b   : > { %v896_v36 = vrot.slane %v866_v24, %v1951_v62 }
 0x33d   : > { %v909_v43 = vsel %vm765_vm6, %v896_v36, %v908_v41 }
 0x33e   : > { %v869_v31 = vpop.permute.xlu1 %868 }
 0x33f   : > { %v900_v38 = vrot.slane %v869_v31, %v1951_v62 }
 0x341   : > { %v910_v45 = vsel %vm767_vm7, %v900_v38, %v909_v43 }
 0x342   : > { %v872_v42 = vpop.permute.xlu1 %871 }
 0x343   : > { %v904_v44 = vrot.slane %v872_v42, %v1951_v62 }
 0x345   : > { %v911_v46 = vsel %vm769_vm8, %v904_v44, %v910_v45 }
 0x346   : > { %v913_v48 = vsel %vm772_vm9, %v911_v46, 0.0 }
 0x347   : > { %914 = vadd.xlane.f32.xlu1 %v913_v48 }
 0x3d0   : > { %v915_v49 = vpop.xlane.xlu1 %914 }
 0x3d1   : > { %v920_v50 = vrot.slane %v915_v49, %v1928_v28  ;;  %v924_v52 = vrot.slane %v915_v49, %v783_v33  ;;  %v928_v53 = vrot.slane %v915_v49, %v787_v34  ;;  %v932_v62 = vrot.slane %v915_v49, %v791_v35 }
 0x3d2   : > { %v936_v54 = vrot.slane %v915_v49, %v795_v40  ;;  %v940_v28 = vrot.slane %v915_v49, %v799_v47  ;;  %v944_v34 = vrot.slane %v915_v49, %v803_v51  ;;  %v948_v40 = vrot.slane %v915_v49, %v807_v55 }
 0x3d3   : > { %1435 = vrcp.f32 %v920_v50 }
 0x3d4   : > { %1437 = vrcp.f32 %v924_v52 }
 0x3d5   : > { %1439 = vrcp.f32 %v928_v53 }
 0x3d6   : > { %1441 = vrcp.f32 %v932_v62 }
 0x3d7   : > { %1443 = vrcp.f32 %v936_v54 }
 0x3d8   : > { %1445 = vrcp.f32 %v940_v28 }
 0x3d9   : > { %1447 = vrcp.f32 %v944_v34 }
 0x3da   : > { %1449 = vrcp.f32 %v948_v40 }
 0x3e0   : > { %v1436_v56 = vpop.eup %1435 }
 0x3e1   : > { %v958_v57 = vmul.f32 %v1436_v56, %v1420_v63  ;;  %v1438_v33 = vpop.eup %1437 }
 0x3e2   : > { %v960_v58 = vmul.f32 %v1438_v33, %v1991_v0  ;;  %v1440_v35 = vpop.eup %1439 }
 0x3e3   : > { %975 = vperm.xlu0 %1386, %v958_v57   ;;  %v962_v59 = vmul.f32 %v1440_v35, %v1994_v3  ;;  %v1442_v60 = vpop.eup %1441 }
 0x3e4   : > { %v964_v47 = vmul.f32 %v1442_v60, %v1997_v5  ;;  %v1444_v61 = vpop.eup %1443 }
 0x3e5   : > { %v966_v51 = vmul.f32 %v1444_v61, %v2000_v20  ;;  %v1446_v63 = vpop.eup %1445 }
 0x3e6   : > { %v968_v0 = vmul.f32 %v1446_v63, %v2003_v6  ;;  %v1448_v1 = vpop.eup %1447 }
 0x3e7   : > { %980 = vperm.xlu0 %1386, %v960_v58   ;;  %v970_v22 = vmul.f32 %v1448_v1, %v2006_v7  ;;  %v1450_v55 = vpop.eup %1449 }
 0x3e8   : > { %v972_v2 = vmul.f32 %v1450_v55, %v2009_v8 }
 0x3eb   : > { %985 = vperm.xlu0 %1386, %v962_v59  }
 0x3ef   : > { %990 = vperm.xlu0 %1386, %v964_v47  }
 0x3f3   : > { %995 = vperm.xlu0 %1386, %v966_v51  }
 0x3f7   : > { %1000 = vperm.xlu0 %1386, %v968_v0  }
 0x3fb   : > { %1005 = vperm.xlu0 %1386, %v970_v22  }
 0x3ff   : > { %1010 = vperm.xlu0 %1386, %v972_v2  }
 0x45e   : > { %v976_v3 = vpop.permute.xlu0 %975 }
 0x45f   : > { %v1013_v20 = vmul.f32 %v976_v3, %v1882_v9 }
 0x461   : > { %v1021_v7 = vsel %vm322_vm1, %v1013_v20, 0.0 }
 0x462   : > { %v981_v4 = vpop.permute.xlu0 %980  ;;  %v1022_v26 = vrot.slane %v1021_v7, 4 }
 0x463   : > { %v1014_v5 = vmul.f32 %v981_v4, %v1886_v11 }
 0x464   : > { %v1023_v31 = vadd.f32 %v1022_v26, %v1021_v7 }
 0x465   : > { %v1028_v6 = vsel %vm322_vm1, %v1014_v5, 0.0 }
 0x466   : > { %v986_v10 = vpop.permute.xlu0 %985  ;;  %v1029_v8 = vrot.slane %v1028_v6, 4  ;;  %v1024_v43 = vrot.slane %v1023_v31, 2 }
 0x467   : > { %v1015_v18 = vmul.f32 %v986_v10, %v1889_v12 }
 0x468   : > { %v1030_v29 = vadd.f32 %v1029_v8, %v1028_v6  ;;  %v1025_v62 = vadd.f32 %v1024_v43, %v1023_v31 }
 0x469   : > { %v1035_v19 = vsel %vm322_vm1, %v1015_v18, 0.0 }
 0x46a   : > { %v991_v21 = vpop.permute.xlu0 %990  ;;  %v1036_v24 = vrot.slane %v1035_v19, 4 }
 0x46b   : > { %v1016_v23 = vmul.f32 %v991_v21, %v1899_v13  ;;  %v1031_v13 = vrot.slane %v1030_v29, 2 }
 0x46c   : > { %v1037_v12 = vadd.f32 %v1036_v24, %v1035_v19 }
 0x46d   : > { %v1042_v25 = vsel %vm322_vm1, %v1016_v23, 0.0  ;;  %v1032_v49 = vadd.f32 %v1031_v13, %v1030_v29 }
 0x46e   : > { %v1043_v11 = vrot.slane %v1042_v25, 4  ;;  %v996_v27 = vpop.permute.xlu0 %995  ;;  %v1038_v41 = vrot.slane %v1037_v12, 2 }
 0x46f   : > { %v1017_v9 = vmul.f32 %v996_v27, %v1902_v14  ;;  %v1033_v34 = vrot.slane %v1032_v49, 1 }
 0x470   : > { %v1044_v32 = vadd.f32 %v1043_v11, %v1042_v25  ;;  %v1039_v52 = vadd.f32 %v1038_v41, %v1037_v12 }
 0x471   : > { %v1049_v30 = vsel %vm322_vm1, %v1017_v9, 0.0  ;;  %v1034_v63 = vadd.f32 %v1033_v34, %v1032_v49 }
 0x472   : > { %v1050_v36 = vrot.slane %v1049_v30, 4  ;;  %v1001_v37 = vpop.permute.xlu0 %1000  ;;  %v1045_v44 = vrot.slane %v1044_v32, 2  ;;  %v1040_v40 = vrot.slane %v1039_v52, 1 }
 0x473   : > { %v1018_v38 = vmul.f32 %v1001_v37, %v1909_v15 }
 0x474   : > { %v1051_v39 = vadd.f32 %v1050_v36, %v1049_v30  ;;  %v1046_v54 = vadd.f32 %v1045_v44, %v1044_v32  ;;  %v1041_v55 = vadd.f32 %v1040_v40, %v1039_v52 }
 0x475   : > { %v1056_v42 = vsel %vm322_vm1, %v1018_v38, 0.0 }
 0x476   : > { %v1057_v45 = vrot.slane %v1056_v42, 4  ;;  %v1006_v46 = vpop.permute.xlu0 %1005  ;;  %v1052_v14 = vrot.slane %v1051_v39, 2  ;;  %v1047_v60 = vrot.slane %v1046_v54, 1 }
 0x477   : > { %v1019_v48 = vmul.f32 %v1006_v46, %v1912_v16  ;;  %v1026_v16 = vrot.slane %v1025_v62, 1 }
 0x478   : > { %v1058_v50 = vadd.f32 %v1057_v45, %v1056_v42  ;;  %v1053_v57 = vadd.f32 %v1052_v14, %v1051_v39 }
 0x479   : > { %v1063_v53 = vsel %vm322_vm1, %v1019_v48, 0.0  ;;  %v1027_v2 = vadd.f32 %v1026_v16, %v1025_v62 }
 0x47a   : > { %v1059_v15 = vrot.slane %v1058_v50, 2  ;;  %v1064_v56 = vrot.slane %v1063_v53, 4  ;;  %v1011_v28 = vpop.permute.xlu0 %1010  ;;  %v1054_v51 = vrot.slane %v1053_v57, 1 }
 0x47b   : > { %v1020_v33 = vmul.f32 %v1011_v28, %v1919_v17  ;;  %v1048_v17 = vadd.f32 %v1047_v60, %v1046_v54  ;;  %v1085_v10 = vsel %vm757_vm2, %v1034_v63, %v1027_v2 }
 0x47c   : > { %v1060_v58 = vadd.f32 %v1059_v15, %v1058_v50  ;;  %v1065_v35 = vadd.f32 %v1064_v56, %v1063_v53  ;;  %v1055_v5 = vadd.f32 %v1054_v51, %v1053_v57  ;;  %v1086_v6 = vsel %vm759_vm3, %v1041_v55, %v1085_v10 }
 0x47d   : > { %v1070_v59 = vsel %vm322_vm1, %v1020_v33, 0.0  ;;  %v1087_v21 = vsel %vm761_vm4, %v1048_v17, %v1086_v6 }
 0x47e   : > { %v1066_v47 = vrot.slane %v1065_v35, 2  ;;  %v1071_v61 = vrot.slane %v1070_v59, 4  ;;  %v1061_v0 = vrot.slane %v1060_v58, 1  ;;  %v1088_v23 = vsel %vm763_vm5, %v1055_v5, %v1087_v21 }
 0x480   : > { %v1067_v1 = vadd.f32 %v1066_v47, %v1065_v35  ;;  %v1072_v22 = vadd.f32 %v1071_v61, %v1070_v59  ;;  %v1062_v20 = vadd.f32 %v1061_v0, %v1060_v58 }
 0x482   : > { %v1068_v3 = vrot.slane %v1067_v1, 1  ;;  %v1073_v4 = vrot.slane %v1072_v22, 2  ;;  %v1089_v8 = vsel %vm765_vm6, %v1062_v20, %v1088_v23 }
 0x484   : > { %v1074_v18 = vadd.f32 %v1073_v4, %v1072_v22  ;;  %v1069_v19 = vadd.f32 %v1068_v3, %v1067_v1 }
 0x486   : > { %v1075_v7 = vrot.slane %v1074_v18, 1  ;;  %v1090_v25 = vsel %vm767_vm7, %v1069_v19, %v1089_v8 }
 0x488   : > { %v1076_v24 = vadd.f32 %v1075_v7, %v1074_v18 }
 0x48a   : > { %v1091_v26 = vsel %vm769_vm8, %v1076_v24, %v1090_v25 }
 0x48b   : > { %1093 = vst.msk [vmem:[%s308_s10] sm:$0xff] %vm322_vm1, %v1091_v26 }
 0x48c   : > { %1572 = shalt.err (!%p1569_p4)
}
 0x48d   : > { %s1573_s11 = scalar_lea.hbm %s2078_s8, 128  ;;  %s1577_s2 = scalar_lea.hbm %s2122_s5, 256 }
 0x48e   : > { %p1574_p6 = scmp.ne.s32.totalorder %s2078_s8, %s1573_s11  ;;  %p1578_p2 = scmp.lt.s32.totalorder %s2078_s8, %s2122_s5 }
 0x48f   : > { %p1579_p5 = scmp.lt.s32.totalorder %s1577_s2, %s1573_s11 }
 0x490   : > { %p1575_p7 = pnand %p1574_p6, %p2149_p10 }
 0x491   : > { %p1580_p12 = por %p1579_p5, %p1578_p2 }
 0x492   : > { %p1576_p8 = pneg %p1575_p7 }
 0x494   : > { %p1581_p0 = pnand %p1580_p12, %p1576_p8 }
 0x496   : > { %1584 = shalt.err (!%p1581_p0)
}
 0x497   : > { %1319 = dma.vmem_to_hbm [thread:$0]  (%p2149_p10), %s1109_s12, 128, %s2078_s8, %s1095_s22  }
 0x498 PF: > { %s1120_s16 = sand.u32 1, %s1623_s18   ;;  %p2150_p3 = scmp.ne.s32.totalorder %s2132_s25, 0 }
 0x499   : > { %p2151_p11 = scmp.ge.s32.totalorder %s1635_s21, 2  ;;  %s1121_s24 = scalar_lea.sflag [#allocation4], %s1120_s16 }
 0x49b   : > { %p1336_p9 = pnand %p2151_p11, %p2150_p3 }
 0x49d   : > { %p1337_p13 = pneg %p1336_p9 }
 0x49f   : > { %1618 = dma.done.wait (%p1337_p13), %s1121_s24, 128  }
 0x4a0   : > { %1620 = vsyncadd (%p1337_p13), %s1121_s24, 4294967168  ;;  %p22_p1 = scmp.ge.s32.totalorder %s1756_s15, 4   ;;  %s2152_s18 = smov %s1627_s19 }
 0x4a1   : > { %s2153_s19 = smov %s1631_s20  ;;  %s2154_s20 = smov %s1772_s27 }
 0x4a2   : > { %s2155_s21 = smov %s1756_s15  ;;  %24 = sbr.rel (!%p22_p1) target bundleno = 12 (0xc), region = 106 }
 0x4a7   :  { %1126 = vsyncpa [#allocation3], 1 }
 0x4a8   :  { %1128 = vsyncpa [#allocation3 + $0x1], 1 }
 0x4a9   :  { %1129 = vsyncpa [#allocation6], 1 }
 0x4aa   :  { %1131 = vsyncpa [#allocation6 + $0x1], 1 }
 0x4ab   :  { %1132 = vsyncpa [#allocation9], 1 }
 0x4ac   :  { %1133 = vsyncpa [#allocation4], 1 }
 0x4ad   :  { %1135 = vsyncpa [#allocation4 + $0x1], 1 }

</bundles_post_ra>
